<compile_context>
chip_gen: v6e
topology: v6e:2x2x1
jax: 0.10.0
libtpu: 0.0.40
codegen_flags: <defaults>
</compile_context>

<pallas_src>
import math
import functools

import jax
import jax.numpy as jnp
from jax import lax
from jax.experimental import pallas as pl
from jax.experimental.pallas import tpu as pltpu

NEG_SLOPE = 0.01  # nn.LeakyReLU(negative_slope=0.01)


def _leaky_relu(x):
    return jnp.where(x >= 0, x, NEG_SLOPE * x)


def attention_output_kernel(q_ref, k_ref, v_ref, w_ref, b_ref, out_ref, *,
                            scale, matmul_dtype):
    q = q_ref[...]                       # (TB, 2, TQ, F) planar real/imag
    k = k_ref[...]                       # (TB, 2, N,  F)
    v = v_ref[...]                       # (TB, 2, N,  F)
    TB, _, TQ, F = q.shape
    N = k.shape[2]
    F_out = w_ref.shape[1]

    # Fold 1/sqrt(num_nodes) into Q (2*TQ*F multiplies, not TQ*N).
    qcat = q.reshape(TB, 2 * TQ, F) * scale      # [Qr; Qi] stacked on rows
    kr = k[:, 0]                                  # (TB, N, F)
    ki = k[:, 1]
    if matmul_dtype != jnp.float32:
        qcat = qcat.astype(matmul_dtype)
        kr = kr.astype(matmul_dtype)
        ki = ki.astype(matmul_dtype)

    # Contract on the feature axis (no K transpose); batch over TB.
    dn_qk = (((2,), (2,)), ((0,), (0,)))
    S1 = lax.dot_general(qcat, kr, dn_qk,
                         preferred_element_type=jnp.float32)  # [QrKr; QiKr]
    S2 = lax.dot_general(qcat, ki, dn_qk,
                         preferred_element_type=jnp.float32)  # [QrKi; QiKi]
    # Sublane-axis slices only (aligned: TQ % 8 == 0 or TQ == N) -> no lane relayout.
    s_real = S1[:, :TQ, :] - S2[:, TQ:, :]       # QrKr - QiKi
    s_imag = S2[:, :TQ, :] + S1[:, TQ:, :]       # QrKi + QiKr

    # strict upper-triangular mask (torch.triu(..., diagonal=1)), built in-kernel
    row = pl.program_id(1) * TQ + lax.broadcasted_iota(jnp.int32, (TQ, N), 0)
    col = lax.broadcasted_iota(jnp.int32, (TQ, N), 1)
    masked = col > row                            # (TQ, N), broadcasts over TB
    # masked_fill(mask, -inf) on a complex tensor fills real=-inf, imag=0.
    s_real = jnp.where(masked, -jnp.inf, s_real)
    s_imag = jnp.where(masked, 0.0, s_imag)

    # TODO(synk): the reference calls nn.LeakyReLU with a dim=-1 kwarg (a
    # TypeError in PyTorch); we apply plain elementwise LeakyReLU(0.01) as the
    # module's __init__ intends. No softmax exists in the reference, so masked
    # rows propagate -inf/NaN exactly like the original module.
    a_real = _leaky_relu(s_real)
    a_imag = _leaky_relu(s_imag)

    # Interleave (real, imag) planes on a leading axis so one batched matmul
    # covers both; leading-dim stack/reshape are placement-only (no relayout).
    a = jnp.stack([a_real, a_imag], axis=1).reshape(TB * 2, TQ, N)
    v2 = v.reshape(TB * 2, N, F)
    if matmul_dtype != jnp.float32:
        a = a.astype(matmul_dtype)
        v2 = v2.astype(matmul_dtype)

    dn_av = (((2,), (1,)), ((0,), (0,)))
    ctx = lax.dot_general(a, v2, dn_av,
                          preferred_element_type=jnp.float32)   # (2TB, TQ, F)
    if matmul_dtype != jnp.float32:
        ctx = ctx.astype(matmul_dtype)

    # att_map == nn.Linear(F, F_out) applied to both planes at once.
    proj = lax.dot_general(ctx, w_ref[...], (((2,), (0,)), ((), ())),
                           preferred_element_type=jnp.float32)  # (2TB, TQ, F_out)
    proj = proj + b_ref[...]                                    # bias on both planes

    # Single full-block store: (TB, 2, TQ, F_out); no concat, no lane slices.
    out_ref[...] = proj.reshape(TB, 2, TQ, F_out)


def _footprint_bytes(tb, tq, N, F, F_out, mm_itemsize):
    """Rough per-step VMEM working set (double-buffered blocks + temporaries)."""
    f32 = 4
    qkv_in = 2 * (tb * 2 * tq * F + 2 * tb * 2 * N * F) * f32   # q + k + v blocks, x2 buffers
    consts = 2 * (F * F_out * mm_itemsize + F_out * f32)        # weight + bias blocks
    out_blk = 2 * tb * 2 * tq * F_out * f32                     # output block, x2 buffers
    scores = 2 * tb * 2 * tq * N * f32                          # S1, S2
    acts = 4 * tb * tq * N * f32                                 # s_real/s_imag/a_real/a_imag
    mm_ops = (tb * 2 * tq * N + tb * 2 * N * F + tb * 2 * tq * F) * mm_itemsize
    ctx = tb * 2 * tq * (F + F_out) * f32
    return qkv_in + consts + out_blk + scores + acts + mm_ops + ctx


def _pick_tiles(B, N, F, F_out, mm_itemsize, budget_bytes=40 * 1024 * 1024):
    """VMEM-aware (batch_tile, query_tile): fit budget, prefer >=2 and even grid
    steps (v7x has 2 TensorCores), then the largest tiles (amortize per-step
    overhead)."""
    tq_cands = [d for d in range(N, 0, -1)
                if N % d == 0 and (d == N or d % 8 == 0)] or [N]
    tb_cands = [d for d in range(B, 0, -1) if B % d == 0]
    best = None
    for tq in tq_cands:
        for tb in tb_cands:
            if _footprint_bytes(tb, tq, N, F, F_out, mm_itemsize) > budget_bytes:
                continue
            steps = (B // tb) * (N // tq)
            key = (steps >= 2, steps % 2 == 0, tb, tq)
            if best is None or key > best[0]:
                best = (key, tb, tq)
    if best is None:
        # TODO(synk): ragged N with no VMEM-fitting tiling; fall back and rely on
        # the explicit vmem_limit_bytes headroom below.
        return 1, tq_cands[-1]
    return best[1], best[2]


def attention_output(Q, K, V, att_w, att_b, num_nodes, *,
                     batch_tile=None, query_tile=None,
                     matmul_dtype=jnp.bfloat16):
    """Q, K, V: (B, N, F, 2) float32; att_w: (F_out, F); att_b: (F_out,)."""
    B, N, F, two = Q.shape
    assert two == 2
    F_out = att_w.shape[0]
    scale = 1.0 / math.sqrt(num_nodes)

    # Planar real/imag layout: one contiguous transpose per tensor instead of
    # six strided [..., k] gathers; 3 input DMA streams.
    q_pl = jnp.moveaxis(Q, -1, 1)      # (B, 2, N, F)
    k_pl = jnp.moveaxis(K, -1, 1)
    v_pl = jnp.moveaxis(V, -1, 1)

    mm_itemsize = jnp.dtype(matmul_dtype).itemsize
    w_t = att_w.T.astype(matmul_dtype)                     # (F, F_out): kernel does x @ W
    b2 = att_b.reshape(1, F_out).astype(jnp.float32)

    tb_auto, tq_auto = _pick_tiles(B, N, F, F_out, mm_itemsize)
    tb = batch_tile if batch_tile is not None else tb_auto
    tq = query_tile if query_tile is not None else tq_auto
    assert B % tb == 0, "batch_tile must divide B"
    assert N % tq == 0, "query_tile must divide N"
    grid = (B // tb, N // tq)

    vmem_bytes = _footprint_bytes(tb, tq, N, F, F_out, mm_itemsize)
    vmem_limit = max(32 * 1024 * 1024,
                     min(100 * 1024 * 1024, int(vmem_bytes * 1.5) + (1 << 20)))

    spec_q = pl.BlockSpec((tb, 2, tq, F), lambda i, j: (i, 0, j, 0))
    spec_kv = pl.BlockSpec((tb, 2, N, F), lambda i, j: (i, 0, 0, 0))
    spec_w = pl.BlockSpec((F, F_out), lambda i, j: (0, 0))
    spec_b = pl.BlockSpec((1, F_out), lambda i, j: (0, 0))
    spec_out = pl.BlockSpec((tb, 2, tq, F_out), lambda i, j: (i, 0, j, 0))

    out = pl.pallas_call(
        functools.partial(attention_output_kernel, scale=scale,
                          matmul_dtype=matmul_dtype),
        out_shape=jax.ShapeDtypeStruct((B, 2, N, F_out), jnp.float32),
        grid_spec=pltpu.PrefetchScalarGridSpec(
            num_scalar_prefetch=0,
            grid=grid,
            in_specs=[spec_q, spec_kv, spec_kv, spec_w, spec_b],
            out_specs=spec_out,
        ),
        compiler_params=pltpu.CompilerParams(
            dimension_semantics=("parallel", "parallel"),
            vmem_limit_bytes=vmem_limit),
    )(q_pl, k_pl, v_pl, w_t, b2)

    # (B, 2, N, F_out) -> (B, N, F_out, 2) == torch.stack([real, imag], dim=-1)
    return jnp.moveaxis(out, 1, -1)


def _reference(Q, K, V, att_w, att_b, num_nodes):
    """Pure-JAX reference (mirrors the PyTorch module)."""
    hp = lax.Precision.HIGHEST
    scale = 1.0 / math.sqrt(num_nodes)
    Qr, Qi = Q[..., 0], Q[..., 1]
    Kr, Ki = K[..., 0], K[..., 1]
    Vr, Vi = V[..., 0], V[..., 1]
    s_real = (jnp.einsum('bik,bjk->bij', Qr, Kr, precision=hp)
              - jnp.einsum('bik,bjk->bij', Qi, Ki, precision=hp)) * scale
    s_imag = (jnp.einsum('bik,bjk->bij', Qr, Ki, precision=hp)
              + jnp.einsum('bik,bjk->bij', Qi, Kr, precision=hp)) * scale
    N = Q.shape[1]
    row = lax.broadcasted_iota(jnp.int32, (N, N), 0)
    col = lax.broadcasted_iota(jnp.int32, (N, N), 1)
    m = col > row
    s_real = jnp.where(m, -jnp.inf, s_real)
    s_imag = jnp.where(m, 0.0, s_imag)
    a_real = jnp.where(s_real >= 0, s_real, NEG_SLOPE * s_real)
    a_imag = jnp.where(s_imag >= 0, s_imag, NEG_SLOPE * s_imag)
    ctx_r = jnp.einsum('bij,bjf->bif', a_real, Vr, precision=hp)
    ctx_i = jnp.einsum('bij,bjf->bif', a_imag, Vi, precision=hp)
    out_r = jnp.einsum('bif,fo->bio', ctx_r, att_w.T, precision=hp) + att_b
    out_i = jnp.einsum('bif,fo->bio', ctx_i, att_w.T, precision=hp) + att_b
    return jnp.stack([out_r, out_i], axis=-1)


if __name__ == "__main__":
    B, N, F = 4, 8, 32          # batch, num_nodes, nfeat
    key = jax.random.PRNGKey(0)
    kq, kk, kv, kw, kb = jax.random.split(key, 5)

    Q = jax.random.normal(kq, (B, N, F, 2), dtype=jnp.float32)
    K = jax.random.normal(kk, (B, N, F, 2), dtype=jnp.float32)
    V = jax.random.normal(kv, (B, N, F, 2), dtype=jnp.float32)

    # att_map ~ nn.Linear(nfeat, nfeat), PyTorch-style uniform init
    bound = 1.0 / math.sqrt(F)
    att_w = jax.random.uniform(kw, (F, F), minval=-bound, maxval=bound,
                               dtype=jnp.float32)
    att_b = jax.random.uniform(kb, (F,), minval=-bound, maxval=bound,
                               dtype=jnp.float32)

    ref = _reference(Q, K, V, att_w, att_b, num_nodes=N)

    # Only the last query row is fully unmasked (finite) in the reference
    # module too; masked rows are -inf/NaN by construction, so validate there.

    # Default path: bf16 matmul operands with f32 accumulation (v5e/v6e/v7x MXU).
    out_bf16 = jax.block_until_ready(
        attention_output(Q, K, V, att_w, att_b, num_nodes=N))
    assert out_bf16.shape == (B, N, F, 2)
    assert bool(jnp.allclose(out_bf16[:, -1], ref[:, -1], rtol=5e-2, atol=5e-2)), \
        "bf16 kernel mismatch vs reference on unmasked row"

    # Full-f32 path: tight check.
    out_f32 = jax.block_until_ready(
        attention_output(Q, K, V, att_w, att_b, num_nodes=N,
                         matmul_dtype=jnp.float32))
    assert out_f32.shape == (B, N, F, 2)
    assert bool(jnp.allclose(out_f32[:, -1], ref[:, -1], rtol=1e-2, atol=1e-2)), \
        "f32 kernel mismatch vs reference on unmasked row"

    print("KERNEL_OK")
</pallas_src>

<mosaic_0001>
module attributes {stable_mosaic.version = 11 : i64} {
  func.func @attention_output_kernel(%arg0: i32, %arg1: i32, %arg2: memref<2x2x8x32xf32, #tpu.memory_space<vmem>>, %arg3: memref<2x2x8x32xf32, #tpu.memory_space<vmem>>, %arg4: memref<2x2x8x32xf32, #tpu.memory_space<vmem>>, %arg5: memref<32x32xbf16, #tpu.memory_space<vmem>>, %arg6: memref<1x32xf32, #tpu.memory_space<vmem>>, %arg7: memref<2x2x8x32xf32, #tpu.memory_space<vmem>>) attributes {dimension_semantics = [#tpu.dimension_semantics<parallel>, #tpu.dimension_semantics<parallel>], iteration_bounds = array<i64: 2, 1>, scalar_prefetch = 0 : i64, scratch_operands = 0 : i64, tpu.core_type = #tpu.core_type<tc>, window_params = [{transform_indices = @transform_0, window_bounds = array<i64: 2, 2, 8, 32>}, {transform_indices = @transform_1, window_bounds = array<i64: 2, 2, 8, 32>}, {transform_indices = @transform_2, window_bounds = array<i64: 2, 2, 8, 32>}, {pipeline_mode = #tpu.pipeline_mode<synchronous>, transform_indices = @transform_3, window_bounds = array<i64: 32, 32>}, {pipeline_mode = #tpu.pipeline_mode<synchronous>, transform_indices = @transform_4, window_bounds = array<i64: 1, 32>}, {transform_indices = @transform_5, window_bounds = array<i64: 2, 2, 8, 32>}]} {
    %c0 = arith.constant 0 : index
    %c0_0 = arith.constant 0 : index
    %c0_1 = arith.constant 0 : index
    %c0_2 = arith.constant 0 : index
    %0 = vector.load %arg2[%c0, %c0_0, %c0_1, %c0_2] : memref<2x2x8x32xf32, #tpu.memory_space<vmem>>, vector<2x2x8x32xf32>
    %c0_3 = arith.constant 0 : index
    %c0_4 = arith.constant 0 : index
    %c0_5 = arith.constant 0 : index
    %c0_6 = arith.constant 0 : index
    %1 = vector.load %arg3[%c0_3, %c0_4, %c0_5, %c0_6] : memref<2x2x8x32xf32, #tpu.memory_space<vmem>>, vector<2x2x8x32xf32>
    %c0_7 = arith.constant 0 : index
    %c0_8 = arith.constant 0 : index
    %c0_9 = arith.constant 0 : index
    %c0_10 = arith.constant 0 : index
    %2 = vector.load %arg4[%c0_7, %c0_8, %c0_9, %c0_10] : memref<2x2x8x32xf32, #tpu.memory_space<vmem>>, vector<2x2x8x32xf32>
    %3 = vector.shape_cast %0 : vector<2x2x8x32xf32> to vector<2x16x32xf32>
    %cst = arith.constant 0.353553385 : f32
    %4 = vector.broadcast %cst : f32 to vector<2x16x32xf32>
    %5 = arith.mulf %3, %4 : vector<2x16x32xf32>
    %6 = vector.extract_strided_slice %1 {offsets = [0, 0, 0, 0], sizes = [2, 1, 8, 32], strides = [1, 1, 1, 1]} : vector<2x2x8x32xf32> to vector<2x1x8x32xf32>
    %7 = vector.shape_cast %6 : vector<2x1x8x32xf32> to vector<2x8x32xf32>
    %8 = vector.extract_strided_slice %1 {offsets = [0, 1, 0, 0], sizes = [2, 1, 8, 32], strides = [1, 1, 1, 1]} : vector<2x2x8x32xf32> to vector<2x1x8x32xf32>
    %9 = vector.shape_cast %8 : vector<2x1x8x32xf32> to vector<2x8x32xf32>
    %10 = arith.truncf %5 : vector<2x16x32xf32> to vector<2x16x32xbf16>
    %11 = arith.truncf %7 : vector<2x8x32xf32> to vector<2x8x32xbf16>
    %12 = arith.truncf %9 : vector<2x8x32xf32> to vector<2x8x32xbf16>
    %cst_11 = arith.constant dense<0.000000e+00> : vector<2x16x8xf32>
    %13 = tpu.matmul %10, %11, %cst_11 {dimension_numbers = #tpu.dot_dimension_numbers<[2], [2], [1], [1], [0, 0, 0, 1, 1, 1], [0], [0]>} : vector<2x16x32xbf16>, vector<2x8x32xbf16>, vector<2x16x8xf32> -> vector<2x16x8xf32>
    %cst_12 = arith.constant dense<0.000000e+00> : vector<2x16x8xf32>
    %14 = tpu.matmul %10, %12, %cst_12 {dimension_numbers = #tpu.dot_dimension_numbers<[2], [2], [1], [1], [0, 0, 0, 1, 1, 1], [0], [0]>} : vector<2x16x32xbf16>, vector<2x8x32xbf16>, vector<2x16x8xf32> -> vector<2x16x8xf32>
    %15 = vector.extract_strided_slice %13 {offsets = [0, 0, 0], sizes = [2, 8, 8], strides = [1, 1, 1]} : vector<2x16x8xf32> to vector<2x8x8xf32>
    %16 = vector.extract_strided_slice %14 {offsets = [0, 8, 0], sizes = [2, 8, 8], strides = [1, 1, 1]} : vector<2x16x8xf32> to vector<2x8x8xf32>
    %17 = arith.subf %15, %16 : vector<2x8x8xf32>
    %18 = vector.extract_strided_slice %14 {offsets = [0, 0, 0], sizes = [2, 8, 8], strides = [1, 1, 1]} : vector<2x16x8xf32> to vector<2x8x8xf32>
    %19 = vector.extract_strided_slice %13 {offsets = [0, 8, 0], sizes = [2, 8, 8], strides = [1, 1, 1]} : vector<2x16x8xf32> to vector<2x8x8xf32>
    %20 = arith.addf %18, %19 : vector<2x8x8xf32>
    %c8_i32 = arith.constant 8 : i32
    %21 = arith.muli %arg1, %c8_i32 : i32
    %22 = tpu.iota {dimensions = array<i32: 0>} : vector<8x8xi32>
    %23 = vector.broadcast %21 : i32 to vector<8x8xi32>
    %24 = arith.addi %23, %22 : vector<8x8xi32>
    %25 = tpu.iota {dimensions = array<i32: 1>} : vector<8x8xi32>
    %26 = arith.cmpi sgt, %25, %24 : vector<8x8xi32>
    %cst_13 = arith.constant 0xFF800000 : f32
    %27 = vector.shape_cast %26 : vector<8x8xi1> to vector<1x8x8xi1>
    %28 = vector.broadcast %27 : vector<1x8x8xi1> to vector<2x8x8xi1>
    %29 = vector.broadcast %cst_13 : f32 to vector<2x8x8xf32>
    %30 = arith.select %28, %29, %17 : vector<2x8x8xi1>, vector<2x8x8xf32>
    %cst_14 = arith.constant 0.000000e+00 : f32
    %31 = vector.shape_cast %26 : vector<8x8xi1> to vector<1x8x8xi1>
    %32 = vector.broadcast %31 : vector<1x8x8xi1> to vector<2x8x8xi1>
    %33 = vector.broadcast %cst_14 : f32 to vector<2x8x8xf32>
    %34 = arith.select %32, %33, %20 : vector<2x8x8xi1>, vector<2x8x8xf32>
    %cst_15 = arith.constant 0.000000e+00 : f32
    %35 = vector.broadcast %cst_15 : f32 to vector<2x8x8xf32>
    %36 = arith.cmpf oge, %30, %35 : vector<2x8x8xf32>
    %cst_16 = arith.constant 0.00999999977 : f32
    %37 = vector.broadcast %cst_16 : f32 to vector<2x8x8xf32>
    %38 = arith.mulf %37, %30 : vector<2x8x8xf32>
    %39 = arith.select %36, %30, %38 : vector<2x8x8xi1>, vector<2x8x8xf32>
    %cst_17 = arith.constant 0.000000e+00 : f32
    %40 = vector.broadcast %cst_17 : f32 to vector<2x8x8xf32>
    %41 = arith.cmpf oge, %34, %40 : vector<2x8x8xf32>
    %cst_18 = arith.constant 0.00999999977 : f32
    %42 = vector.broadcast %cst_18 : f32 to vector<2x8x8xf32>
    %43 = arith.mulf %42, %34 : vector<2x8x8xf32>
    %44 = arith.select %41, %34, %43 : vector<2x8x8xi1>, vector<2x8x8xf32>
    %45 = vector.shape_cast %39 : vector<2x8x8xf32> to vector<2x1x8x8xf32>
    %46 = vector.shape_cast %44 : vector<2x8x8xf32> to vector<2x1x8x8xf32>
    %47 = tpu.concatenate %45, %46 in 1 : vector<2x1x8x8xf32>, vector<2x1x8x8xf32> -> vector<2x2x8x8xf32>
    %48 = vector.shape_cast %47 : vector<2x2x8x8xf32> to vector<4x8x8xf32>
    %49 = vector.shape_cast %2 : vector<2x2x8x32xf32> to vector<4x8x32xf32>
    %50 = arith.truncf %48 : vector<4x8x8xf32> to vector<4x8x8xbf16>
    %51 = arith.truncf %49 : vector<4x8x32xf32> to vector<4x8x32xbf16>
    %cst_19 = arith.constant dense<0.000000e+00> : vector<4x8x32xf32>
    %52 = tpu.matmul %50, %51, %cst_19 {dimension_numbers = #tpu.dot_dimension_numbers<[2], [1], [1], [2], [0, 0, 0, 1, 1, 2], [0], [0]>} : vector<4x8x8xbf16>, vector<4x8x32xbf16>, vector<4x8x32xf32> -> vector<4x8x32xf32>
    %53 = arith.truncf %52 : vector<4x8x32xf32> to vector<4x8x32xbf16>
    %c0_20 = arith.constant 0 : index
    %c0_21 = arith.constant 0 : index
    %54 = vector.load %arg5[%c0_20, %c0_21] : memref<32x32xbf16, #tpu.memory_space<vmem>>, vector<32x32xbf16>
    %cst_22 = arith.constant dense<0.000000e+00> : vector<4x8x32xf32>
    %55 = tpu.matmul %53, %54, %cst_22 {dimension_numbers = #tpu.dot_dimension_numbers<[2], [0], [0, 1], [1], [0, 0, 0, 1, 1, 1], [], []>} : vector<4x8x32xbf16>, vector<32x32xbf16>, vector<4x8x32xf32> -> vector<4x8x32xf32>
    %c0_23 = arith.constant 0 : index
    %c0_24 = arith.constant 0 : index
    %56 = vector.load %arg6[%c0_23, %c0_24] : memref<1x32xf32, #tpu.memory_space<vmem>>, vector<1x32xf32>
    %57 = vector.shape_cast %56 : vector<1x32xf32> to vector<1x1x32xf32>
    %58 = vector.broadcast %57 : vector<1x1x32xf32> to vector<4x8x32xf32>
    %59 = arith.addf %55, %58 : vector<4x8x32xf32>
    %60 = vector.shape_cast %59 : vector<4x8x32xf32> to vector<2x2x8x32xf32>
    %c0_25 = arith.constant 0 : index
    %c0_26 = arith.constant 0 : index
    %c0_27 = arith.constant 0 : index
    %c0_28 = arith.constant 0 : index
    %61 = vector.load %arg7[%c0_25, %c0_26, %c0_27, %c0_28] : memref<2x2x8x32xf32, #tpu.memory_space<vmem>>, vector<2x2x8x32xf32>
    tpu.vector_store %arg7[%c0_25, %c0_26, %c0_27, %c0_28], %60 {strides = array<i32>} : memref<2x2x8x32xf32, #tpu.memory_space<vmem>>, vector<2x2x8x32xf32>,
    return
  }
  func.func @transform_0(%arg0: i32, %arg1: i32) -> (i32, i32, i32, i32) {
    %c0_i32 = arith.constant 0 : i32
    %c0_i32_0 = arith.constant 0 : i32
    %c0_i32_1 = arith.constant 0 : i32
    return %arg0, %c0_i32, %arg1, %c0_i32_0 : i32, i32, i32, i32
  }
  func.func @transform_1(%arg0: i32, %arg1: i32) -> (i32, i32, i32, i32) {
    %c0_i32 = arith.constant 0 : i32
    %c0_i32_0 = arith.constant 0 : i32
    %c0_i32_1 = arith.constant 0 : i32
    %c0_i32_2 = arith.constant 0 : i32
    return %arg0, %c0_i32, %c0_i32_0, %c0_i32_1 : i32, i32, i32, i32
  }
  func.func @transform_2(%arg0: i32, %arg1: i32) -> (i32, i32, i32, i32) {
    %c0_i32 = arith.constant 0 : i32
    %c0_i32_0 = arith.constant 0 : i32
    %c0_i32_1 = arith.constant 0 : i32
    %c0_i32_2 = arith.constant 0 : i32
    return %arg0, %c0_i32, %c0_i32_0, %c0_i32_1 : i32, i32, i32, i32
  }
  func.func @transform_3(%arg0: i32, %arg1: i32) -> (i32, i32) {
    %c0_i32 = arith.constant 0 : i32
    %c0_i32_0 = arith.constant 0 : i32
    %c0_i32_1 = arith.constant 0 : i32
    return %c0_i32, %c0_i32_0 : i32, i32
  }
  func.func @transform_4(%arg0: i32, %arg1: i32) -> (i32, i32) {
    %c0_i32 = arith.constant 0 : i32
    %c0_i32_0 = arith.constant 0 : i32
    %c0_i32_1 = arith.constant 0 : i32
    return %c0_i32, %c0_i32_0 : i32, i32
  }
  func.func @transform_5(%arg0: i32, %arg1: i32) -> (i32, i32, i32, i32) {
    %c0_i32 = arith.constant 0 : i32
    %c0_i32_0 = arith.constant 0 : i32
    %c0_i32_1 = arith.constant 0 : i32
    return %arg0, %c0_i32, %arg1, %c0_i32_0 : i32, i32, i32, i32
  }
}

</mosaic_0001>

<bundles_post_ra>
// kernel: tpu_custom_call.1
= control target key start
LH: loop header
LB: loop body
LE: loop exit
PB: predicated region body
PF: predicated region fallthrough
CT: control target
= control target key end

     0   :  { %s1808_s0 = inlined_call_operand.hbm [shape: f32[4,2,8,32], index: 0, kind: input, shape index: {}]   ;;  %s1809_s1 = inlined_call_operand.hbm [shape: f32[4,2,8,32], index: 1, kind: input, shape index: {}]   ;;  %s1810_s2 = inlined_call_operand.hbm [shape: f32[4,2,8,32], index: 2, kind: input, shape index: {}]   ;;  %s1811_s3 = inlined_call_operand.hbm [shape: bf16[32,32], index: 3, kind: input, shape index: {}]   ;;  %s1812_s4 = inlined_call_operand.vmem [shape: f32[1,32], index: 4, kind: input, shape index: {}]   ;;  %s1813_s5 = inlined_call_operand.hbm [shape: f32[4,2,8,32], index: 5, kind: output, shape index: {}]  }
   0x1   :  { %1825 = sst [smem:[#allocation19_spill]] %s1808_s0 }
   0x2   :  { %1826 = sst [smem:[#allocation20_spill]] %s1809_s1 }
   0x3   :  { %10 = vsyncpa [#allocation3], 0 }
   0x4   :  { %12 = vsyncpa [#allocation3 + $0x1], 0 }
   0x5   :  { %13 = vsyncpa [#allocation6], 0 }
   0x6   :  { %15 = vsyncpa [#allocation6 + $0x1], 0 }
   0x7   :  { %16 = vsyncpa [#allocation9], 0 }
   0x8   :  { %17 = vsyncpa [#allocation4], 0 }
   0x9   :  { %19 = vsyncpa [#allocation4 + $0x1], 0  ;;  %s1505_s18 = smov 0   ;;  %s1507_s19 = smov 0  }
   0xa   :  { %s1509_s20 = smov 0   ;;  %s1511_s21 = smov 0  }
   0xb   :  { %s1513_s22 = smov 0   ;;  %s1515_s23 = smov 0  }
   0xc LB: > { %1827 = sst [smem:[#allocation15_spill]] %s1456_s22  ;;  %s37_s24 = sadd.s32 1, %s1456_s22  ;;  %s1460_s23 = sphi %s1515_s23, %s25_s23   ;;  %s1456_s22 = sphi %s1513_s22, %s1851_s22   ;;  %s1452_s21 = sphi %s1511_s21, %s1850_s21   ;;  %s1448_s20 = sphi %s1509_s20, %s1854_s20   ;;  %s1444_s19 = sphi %s1507_s19, %s1853_s19   ;;  %s1440_s18 = sphi %s1505_s18, %s1852_s18  }
   0xd   : > { %1828 = sst [smem:[#allocation16_spill]] %s1460_s23  ;;  %s46_s25 = sadd.s32 1, %s1448_s20 }
   0xe   : > { %p39_p0 = scmp.ge.s32.totalorder %s37_s24, 2  ;;  %p53_p1 = scmp.ne.s32.totalorder %s1448_s20, %s1444_s19 }
   0xf   : > { %p54_p2 = scmp.eq.s32.totalorder %s1460_s23, 0  ;;  %p1200_p5 = scmp.lt.s32.totalorder %s1460_s23, 2 }
  0x10   : > { %s1856_s24 = smov (%p39_p0, %s37_s24), 0  ;;  %s1818_s27 = sand.u32 1, %s1448_s20  }
  0x11   : > { %1829 = sst [smem:[#allocation17_spill]] %s1856_s24  ;;  %p55_p4 = por %p54_p2, %p53_p1 }
  0x12   : > { %s41_s26 = ssub.s32 %s1456_s22, %s1856_s24  ;;  %s1552_s28 = sshll.u32 %s1818_s27, 5 }
  0x13   : > { %p44_p6 = scmp.eq.s32.totalorder %s41_s26, 0  ;;  %s1555_s29 = sshll.u32 %s1456_s22, 9 }
  0x14   : > { %p1557_p7 = pnand %p1200_p5, %p55_p4  ;;  %s244_s7 = sand.u32 1, %s1460_s23  }
  0x15   : > { %s1562_s6 = scalar_select %p44_p6, %s1448_s20, %s46_s25  }
  0x16   : > { %s1832_s1 = sld [smem:[#allocation20_spill]]  ;;  %s248_s11 = scalar_lea.vmem [#allocation5], %s1552_s28 }
  0x17   : > { %1831 = sst [smem:[#allocation18_spill]] %s1562_s6  ;;  %s256_s12 = sshll.u32 %s248_s11, 4  ;;  %s257_s12 = int_to_ptr.vmem [resolvable:$true] %s256_s12 }
  0x18   : > { %s1570_s13 = scalar_lea.sflag [#allocation6], %s244_s7  ;;  %p1820_p8 = pneg %p1557_p7 }
  0x19   : > { %s1275_s14 = scalar_lea.vmem %s257_s12, 512  ;;  %s1462_s15 = smov [#allocation5]  }
  0x1a   : > { %p1276_p9 = scmp.ne.s32.totalorder %s257_s12, %s1275_s14  ;;  %s1280_s16 = sshll.u32 %s1462_s15, 4  ;;  %s1281_s16 = int_to_ptr.vmem [resolvable:$false] %s1280_s16 }
  0x1b   : > { %s1282_s17 = scalar_lea.vmem %s1281_s16, 1024  ;;  %p1283_p12 = scmp.lt.s32.totalorder %s257_s12, %s1281_s16 }
  0x1c   : > { %s255_s10 = scalar_lea.hbm %s1832_s1, %s1555_s29  ;;  %p1278_p10 = pnand %p1276_p9, %p1820_p8 }
  0x1d   : > { %p1284_p13 = scmp.lt.s32.totalorder %s1282_s17, %s1275_s14 }
  0x1e   : > { %p1279_p11 = pneg %p1278_p10 }
  0x1f   : > { %p1285_p0 = por %p1284_p13, %p1283_p12 }
  0x21   : > { %p1286_p2 = pnand %p1285_p0, %p1279_p11 }
  0x23   : > { %1289 = shalt.err (!%p1286_p2)
}
  0x24   : > { %s1814_s25 = smov 128   ;;  %s1816_s26 = smov 8  }
  0x25   : > { %1191 = dma.hbm_to_vmem [thread:$0]  (!%p1557_p7), %s255_s10, 512, %s257_s12, %s1570_s13, %s1814_s25, %s1814_s25, %s1816_s26  }
  0x26   : > { %s1584_s7 = sadd.s32 4294967295, %s1460_s23   ;;  %s1040_s8 = sadd.s32 4294967294, %s1460_s23  }
  0x27   : > { %p59_p4 = scmp.ne.s32.totalorder %s1444_s19, %s1440_s18  ;;  %p1819_p5 = scmp.eq.s32.totalorder %s1584_s7, 0 }
  0x28   : > { %p179_p6 = scmp.eq.s32.totalorder %s1584_s7, 1  ;;  %p185_p9 = scmp.eq.s32.totalorder %s1040_s8, 1 }
  0x29   : > { %p1041_p10 = scmp.ge.s32.totalorder %s1460_s23, 1  ;;  %p1594_p11 = por %p1819_p5, %p59_p4 }
  0x2a   : > { %p1601_p12 = por %p179_p6, %p53_p1  ;;  %p1605_p13 = por %p185_p9, %p59_p4 }
  0x2b   : > { %p192_p0 = scmp.lt.s32.totalorder %s1460_s23, 3  ;;  %s1465_s14 = smov [#allocation8]  }
  0x2c   : > { %s204_s15 = sshll.u32 %s1465_s14, 4  ;;  %s1838_s0 = sld [smem:[#allocation19_spill]]  ;;  %s205_s15 = int_to_ptr.vmem [resolvable:$true] %s204_s15 }
  0x2d   : > { %p1610_p2 = pnand %p1041_p10, %p192_p0  ;;  %s225_s26 = scalar_lea.vmem [#allocation2], %s1552_s28 }
  0x2e   : > { %s234_s27 = sshll.u32 %s225_s26, 4  ;;  %s1301_s14 = scalar_lea.vmem %s205_s15, 256  ;;  %s1627_s27 = int_to_ptr.vmem [resolvable:$true] %s234_s27 }
  0x2f   : > { %p1181_p3 = pneg %p1610_p2  ;;  %p1302_p6 = scmp.ne.s32.totalorder %s205_s15, %s1301_s14 }
  0x30   : > { %p1309_p0 = scmp.lt.s32.totalorder %s205_s15, %s205_s15 }
  0x31   : > { %p1618_p1 = pnand %p1181_p3, %p1819_p5  ;;  %p1310_p3 = scmp.lt.s32.totalorder %s1301_s14, %s1301_s14 }
  0x33   : > { %p1292_p4 = pneg %p1618_p1  ;;  %p1311_p5 = por %p1310_p3, %p1309_p0 }
  0x35   : > { %p1304_p9 = pnand %p1302_p6, %p1292_p4 }
  0x37   : > { %p1305_p10 = pneg %p1304_p9 }
  0x39   : > { %p1312_p8 = pnand %p1311_p5, %p1305_p10 }
  0x3b   : > { %1315 = shalt.err (!%p1312_p8)
}
  0x3c   : > { %s1466_s1 = smov 64   ;;  %s1467_s26 = smov 4  }
  0x3d   : > { %1184 = dma.hbm_to_vmem [thread:$0]  (!%p1618_p1), %s1811_s3, 256, %s205_s15, [#allocation9], %s1466_s1, %s1466_s1, %s1467_s26  }
  0x3e   : > { %s1839_s25 = sand.u32 1, %s1448_s20   ;;  %s1329_s22 = scalar_lea.vmem %s1627_s27, 512 }
  0x3f   : > { %s222_s24 = scalar_lea.sflag [#allocation3], %s1839_s25  ;;  %p1330_p4 = scmp.ne.s32.totalorder %s1627_s27, %s1329_s22 }
  0x40   : > { %p1840_p5 = pneg %p1557_p7  ;;  %s1468_s14 = smov [#allocation2]  }
  0x41   : > { %s1334_s6 = sshll.u32 %s1468_s14, 4  ;;  %s1335_s6 = int_to_ptr.vmem [resolvable:$false] %s1334_s6 }
  0x42   : > { %p1332_p8 = pnand %p1330_p4, %p1840_p5  ;;  %s1336_s23 = scalar_lea.vmem %s1335_s6, 1024 }
  0x43   : > { %p1337_p9 = scmp.lt.s32.totalorder %s1627_s27, %s1335_s6  ;;  %p1338_p10 = scmp.lt.s32.totalorder %s1336_s23, %s1329_s22 }
  0x44   : > { %p1333_p6 = pneg %p1332_p8 }
  0x45   : > { %p1339_p0 = por %p1338_p10, %p1337_p9 }
  0x47   : > { %p1340_p3 = pnand %p1339_p0, %p1333_p6 }
  0x49   : > { %1343 = shalt.err (!%p1340_p3)
}
  0x4a   : > { %s1841_s1 = smov 8   ;;  %s1842_s15 = smov 128  }
  0x4b   : > { %s1843_s26 = scalar_lea.hbm %s1838_s0, %s1555_s29  ;;  %s277_s23 = scalar_lea.hbm %s1810_s2, %s1555_s29 }
  0x4c   : > { %1188 = dma.hbm_to_vmem [thread:$0]  (!%p1557_p7), %s1843_s26, 512, %s1627_s27, %s222_s24, %s1842_s15, %s1842_s15, %s1841_s1  }
  0x4d   : > { %s270_s17 = scalar_lea.vmem [#allocation7], %s1552_s28  ;;  %p1844_p4 = pmov %p1840_p5 }
  0x4e   : > { %s278_s8 = sshll.u32 %s270_s17, 4  ;;  %s1469_s25 = smov [#allocation7]   ;;  %s279_s8 = int_to_ptr.vmem [resolvable:$true] %s278_s8 }
  0x4f   : > { %s1357_s14 = scalar_lea.vmem %s279_s8, 512  ;;  %s1362_s16 = sshll.u32 %s1469_s25, 4  ;;  %s1363_s16 = int_to_ptr.vmem [resolvable:$false] %s1362_s16 }
  0x50   : > { %p1358_p1 = scmp.ne.s32.totalorder %s279_s8, %s1357_s14  ;;  %s1364_s0 = scalar_lea.vmem %s1363_s16, 1024 }
  0x51   : > { %p1365_p6 = scmp.lt.s32.totalorder %s279_s8, %s1363_s16  ;;  %p1366_p9 = scmp.lt.s32.totalorder %s1364_s0, %s1357_s14 }
  0x52   : > { %p1360_p5 = pnand %p1358_p1, %p1844_p4 }
  0x53   : > { %p1367_p10 = por %p1366_p9, %p1365_p6 }
  0x54   : > { %p1361_p8 = pneg %p1360_p5 }
  0x56   : > { %p1368_p0 = pnand %p1367_p10, %p1361_p8 }
  0x58   : > { %1371 = shalt.err (!%p1368_p0)
}
  0x59   : > { %1194 = dma.hbm_to_vmem [thread:$0]  (!%p1557_p7), %s277_s23, 512, %s279_s8, %s1570_s13, %s1842_s15, %s1842_s15, %s1841_s1  }
  0x5a   : > { %290 = sbr.rel (%p1610_p2) target bundleno = 744 (0x2e8), region = 40  ;;  %s1672_s24 = sand.u32 (!%p1610_p2), 1, %s1444_s19  }
  0x5b   : > { %s1675_s0 = sshll.u32 (!%p1610_p2), %s1672_s24, 5  ;;  %s293_s27 = scalar_lea.sflag (!%p1610_p2), [#allocation3], %s1672_s24 }
  0x5c   : > { %s296_s28 = scalar_lea.vmem (!%p1610_p2), [#allocation2], %s1675_s0 }
  0x5f   : > { %1423 = dma.done.wait (%p1594_p11), %s293_s27, 512  }
  0x60   : > { %1425 = vsyncadd (%p1594_p11), %s293_s27, 4294966784  ;;  %s301_s29 = sand.u32 1, %s1584_s7   ;;  %s305_s13 = scalar_lea.vmem [#allocation5], %s1675_s0 }
  0x61   : > { %s302_s30 = scalar_lea.sflag [#allocation6], %s301_s29 }
  0x62   : > { %1427 = dma.done.wait (%p1594_p11), %s302_s30, 1024  }
  0x63   : > { %1429 = vsyncadd (%p1594_p11), %s302_s30, 4294966272  ;;  %s1690_s12 = scalar_lea.vmem [#allocation7], %s1675_s0  ;;  %p1845_p7 = scmp.eq.s32.totalorder %s1584_s7, 0 }
  0x65   : > { %1431 = dma.done.wait (%p1845_p7), [#allocation9], 256   ;;  %p1846_p2 = pmov %p1845_p7 }
  0x66   : > { %v1470_v0 = vmov 0.0   ;;  %vm1471_vm0 = vmmov 0   ;;  %v364_v1 = vld [vmem:[%s305_s13] sm:$0xff]  ;;  %vm382_vm1 = vcmask 261120   ;;  %v366_v2 = vld [vmem:[%s305_s13 + $0x10] sm:$0xff]  ;;  %v361_v6 = vld [vmem:[%s296_s28 + $0x8] sm:$0xff]  ;;  %v570_v31 = vlaneseq }
  0x67   : > { %1433 = vsyncadd (%p1846_p2), [#allocation9], 4294967040  ;;  %1113 = vmatprep.subr.bf16.mxu0 %v1470_v0  ;;  %1119 = vmatprep.subr.bf16.mxu1 %v1470_v0  ;;  %v360_v3 = vld [vmem:[%s296_s28] sm:$0xff]  ;;  %v378_v4 = vpack.c.bf16 %v364_v1, %v364_v1  ;;  %v379_v5 = vpack.c.bf16 %v366_v2, %v366_v2  ;;  %v362_v8 = vld [vmem:[%s296_s28 + $0x10] sm:$0xff]  ;;  %v373_v10 = vmul.f32 0.35355338, %v361_v6 }
  0x68   : > { %1115 = vmatprep.mubr.msk.bf16.mxu0 %vm1471_vm0, %v1470_v0  ;;  %1121 = vmatprep.mubr.msk.bf16.mxu1 %vm1471_vm0, %v1470_v0  ;;  %v372_v7 = vmul.f32 0.35355338, %v360_v3  ;;  %v363_v9 = vld [vmem:[%s296_s28 + $0x18] sm:$0xff]  ;;  %v374_v11 = vmul.f32 0.35355338, %v362_v8  ;;  %v365_v15 = vld [vmem:[%s305_s13 + $0x8] sm:$0xff] }
  0x69   : > { %v375_v12 = vmul.f32 0.35355338, %v363_v9  ;;  %v387_v13 = vsel %vm382_vm1, %v378_v4, 0  ;;  %v434_v14 = vsel %vm382_vm1, %v379_v5, 0  ;;  %v367_v16 = vld [vmem:[%s305_s13 + $0x18] sm:$0xff]  ;;  %v380_v17 = vpack.c.bf16 %v365_v15, %v365_v15  ;;  %v369_v23 = vld [vmem:[%s1690_s12 + $0x8] sm:$0xff] }
  0x6a   : > { %1114 = vmatpush3.bf16.xpose.msra.mxu0 %v387_v13  ;;  %1120 = vmatpush3.bf16.xpose.msra.mxu1 %v434_v14  ;;  %v381_v18 = vpack.c.bf16 %v367_v16, %v367_v16  ;;  %v376_v19 = vpack.c.bf16 %v373_v10, %v372_v7  ;;  %v600_v24 = vpack.c.bf16 %v369_v23, %v369_v23  ;;  %vm607_vm2 = vcmask 1043456   ;;  %v368_v26 = vld [vmem:[%s1690_s12] sm:$0xff]  ;;  %v371_v42 = vld [vmem:[%s1690_s12 + $0x18] sm:$0xff]  ;;  %v370_v52 = vld [vmem:[%s1690_s12 + $0x10] sm:$0xff]  ;;  %s354_s1 = scalar_lea.vmem [#allocation10], %s1675_s0  ;;  %s1092_s26 = sshll.u32 %s1452_s21, 9 }
  0x6b   : > { %1125 = vmatprep.subr.bf16.mxu0 %v1470_v0  ;;  %1131 = vmatprep.subr.bf16.mxu1 %v1470_v0  ;;  %v377_v20 = vpack.c.bf16 %v375_v12, %v374_v11  ;;  %v478_v21 = vsel %vm382_vm1, %v380_v17, 0  ;;  %v599_v27 = vpack.c.bf16 %v368_v26, %v368_v26  ;;  %v571_v36 = vshrl.u32 %v570_v31, 7  ;;  %v1260_v11 = vld [vmem:[#allocation8 + $0x8] sm:$0xff]   ;;  %v1261_v12 = vld [vmem:[#allocation8] sm:$0xff]   ;;  %s901_s15 = sshll.u32 %s354_s1, 4  ;;  %s1758_s23 = scalar_lea.hbm %s1813_s5, %s1092_s26  ;;  %s1752_s15 = int_to_ptr.vmem [resolvable:$true] %s901_s15 }
  0x6c   : > { %v522_v22 = vsel %vm382_vm1, %v381_v18, 0  ;;  %v655_v25 = vsel %vm607_vm2, %v600_v24, 0  ;;  %v575_v37 = vand.u32 127, %v570_v31  ;;  %v602_v48 = vpack.c.bf16 %v371_v42, %v371_v42  ;;  %s886_s21 = scalar_lea.sflag [#allocation4], %s1672_s24  ;;  %s1372_s17 = scalar_lea.vmem %s1752_s15, 512 }
  0x6d   : > { %v609_v28 = vsel %vm607_vm2, %v599_v27, 0  ;;  %vm603_vm5 = vcmask 64512   ;;  %v601_v61 = vpack.c.bf16 %v370_v52, %v370_v52  ;;  %p1373_p11 = scmp.ne.s32.totalorder %s1752_s15, %s1372_s17  ;;  %s1472_s8 = smov [#allocation10]  }
  0x6e   : > { %vm576_vm3 = vcmp.gt.s32.totalorder %v575_v37, %v571_v36  ;;  %v747_v62 = vsel %vm607_vm2, %v602_v48, 0  ;;  %s1376_s14 = sshll.u32 %s1472_s8, 4  ;;  %s1377_s14 = int_to_ptr.vmem [resolvable:$false] %s1376_s14 }
  0x6f   : > { %v701_v5 = vsel %vm607_vm2, %v601_v61, 0  ;;  %p1374_p3 = pnand %p1373_p11, %p1601_p12  ;;  %s1378_s25 = scalar_lea.vmem %s1377_s14, 1024 }
  0x70   : > { %p1379_p4 = scmp.lt.s32.totalorder %s1752_s15, %s1377_s14  ;;  %p1380_p5 = scmp.lt.s32.totalorder %s1378_s25, %s1372_s17 }
  0x71   : > { %1116 = vmatmul.mubr.msk.bf16.vlgmr.msra.gmra.mxu0 %vm382_vm1, %v376_v19  ;;  %1122 = vmatmul.mubr.msk.bf16.vlgmr.msra.gmra.mxu1 %vm382_vm1, %v377_v20  ;;  %p1375_p1 = pneg %p1374_p3 }
  0x72   : > { %1126 = vmatpush3.bf16.xpose.msra.mxu0 %v478_v21  ;;  %1132 = vmatpush3.bf16.xpose.msra.mxu1 %v522_v22  ;;  %p1381_p8 = por %p1380_p5, %p1379_p4 }
  0x73   : > { %1127 = vmatprep.mubr.msk.bf16.mxu0 %vm1471_vm0, %v1470_v0  ;;  %1133 = vmatprep.mubr.msk.bf16.mxu1 %vm1471_vm0, %v1470_v0 }
  0x74   : > { %1137 = vmatprep.subr.bf16.mxu0 %v1470_v0  ;;  %1143 = vmatprep.subr.bf16.mxu1 %v1470_v0  ;;  %p1382_p6 = pnand %p1381_p8, %p1375_p1 }
  0x79   : > { %1128 = vmatmul.mubr.msk.bf16.vlgmr.msra.gmra.mxu0 %vm382_vm1, %v376_v19  ;;  %1134 = vmatmul.mubr.msk.bf16.vlgmr.msra.gmra.mxu1 %vm382_vm1, %v377_v20 }
  0x7a   : > { %1145 = vmatprep.mubr.msk.bf16.mxu1 %vm1471_vm0, %v1470_v0  ;;  %1139 = vmatprep.mubr.msk.bf16.mxu0 %vm1471_vm0, %v1470_v0 }
  0x7b   : > { %1144 = vmatpush3.bf16.msra.mxu1 %v655_v25  ;;  %1138 = vmatpush3.bf16.msra.mxu0 %v609_v28 }
  0x7c   : > { %1155 = vmatprep.subr.bf16.mxu1 %v1470_v0  ;;  %1149 = vmatprep.subr.bf16.mxu0 %v1470_v0 }
 0x131   : > { %v423_v29 = vpop.f32.mrf.mxu0  ;;  %v470_v30 = vpop.f32.mrf.mxu1 }
 0x133   : > { %v1117_v32 = vpop.f32.mrf.mxu0  ;;  %v1123_v33 = vpop.f32.mrf.mxu1 }
 0x135   : > { %v426_v34 = vpop.f32.mrf.mxu0  ;;  %v473_v35 = vpop.f32.mrf.mxu1 }
 0x137   : > { %v1118_v38 = vpop.f32.mrf.mxu0  ;;  %v1124_v39 = vpop.f32.mrf.mxu1 }
 0x139   : > { %v514_v40 = vpop.f32.mrf.mxu0  ;;  %v558_v41 = vpop.f32.mrf.mxu1 }
 0x13a   : > { %v567_v43 = vadd.f32 %v514_v40, %v426_v34  ;;  %v568_v44 = vadd.f32 %v558_v41, %v473_v35 }
 0x13b   : > { %v1129_v45 = vpop.f32.mrf.mxu0  ;;  %v1135_v46 = vpop.f32.mrf.mxu1 }
 0x13c   : > { %v581_v47 = vsel %vm576_vm3, 0.0, %v567_v43  ;;  %v582_v53 = vsel %vm576_vm3, 0.0, %v568_v44 }
 0x13d   : > { %vm589_vm4 = vcmp.ge.f32.partialorder %v581_v47, 0.0  ;;  %v591_v49 = vmul.f32 0.01, %v581_v47  ;;  %v517_v50 = vpop.f32.mrf.mxu0  ;;  %v561_v51 = vpop.f32.mrf.mxu1  ;;  %v592_v63 = vmul.f32 0.01, %v582_v53  ;;  %vm590_vm7 = vcmp.ge.f32.partialorder %v582_v53, 0.0 }
 0x13e   : > { %v565_v54 = vsub.f32 %v423_v29, %v517_v50  ;;  %v566_v55 = vsub.f32 %v470_v30, %v561_v51  ;;  %v1070_v30 = vld [vmem:[%s1812_s4] ss:$0 sm:$0xff] }
 0x13f   : > { %v593_v56 = vsel %vm589_vm4, %v581_v47, %v591_v49  ;;  %v1130_v57 = vpop.f32.mrf.mxu0  ;;  %v1136_v58 = vpop.f32.mrf.mxu1  ;;  %v594_v6 = vsel %vm590_vm7, %v582_v53, %v592_v63 }
 0x140   : > { %v596_v59 = vpack.c.bf16 %v593_v56, %v593_v56  ;;  %v579_v60 = vsel %vm576_vm3, -inf, %v565_v54  ;;  %v580_v2 = vsel %vm576_vm3, -inf, %v566_v55  ;;  %v598_v8 = vpack.c.bf16 %v594_v6, %v594_v6 }
 0x141   : > { %vm583_vm6 = vcmp.ge.f32.partialorder %v579_v60, 0.0  ;;  %v585_v1 = vmul.f32 0.01, %v579_v60  ;;  %v586_v7 = vmul.f32 0.01, %v580_v2  ;;  %vm584_vm8 = vcmp.ge.f32.partialorder %v580_v2, 0.0 }
 0x142   : > { %1146 = vmatmul.mubr.msk.bf16.vlgmr.msra.gmra.mxu1 %vm603_vm5, %v596_v59 }
 0x143   : > { %v587_v3 = vsel %vm583_vm6, %v579_v60, %v585_v1  ;;  %1156 = vmatpush3.bf16.msra.mxu1 %v747_v62  ;;  %1157 = vmatprep.mubr.msk.bf16.mxu1 %vm1471_vm0, %v1470_v0  ;;  %v588_v9 = vsel %vm584_vm8, %v580_v2, %v586_v7 }
 0x144   : > { %v595_v4 = vpack.c.bf16 %v587_v3, %v587_v3  ;;  %v597_v10 = vpack.c.bf16 %v588_v9, %v588_v9 }
 0x146   : > { %1140 = vmatmul.mubr.msk.bf16.vlgmr.msra.gmra.mxu0 %vm603_vm5, %v595_v4 }
 0x147   : > { %1150 = vmatpush3.bf16.msra.mxu0 %v701_v5  ;;  %1151 = vmatprep.mubr.msk.bf16.mxu0 %vm1471_vm0, %v1470_v0 }
 0x148   : > { %1161 = vmatprep.subr.bf16.mxu0 %v1260_v11 }
 0x14a   : > { %1158 = vmatmul.mubr.msk.bf16.vlgmr.msra.gmra.mxu1 %vm603_vm5, %v598_v8 }
 0x14e   : > { %1152 = vmatmul.mubr.msk.bf16.vlgmr.msra.gmra.mxu0 %vm603_vm5, %v597_v10 }
 0x14f   : > { %1162 = vmatpush3.bf16.msra.mxu0 %v1260_v11 }
 0x150   : > { %1163 = vmatprep.subr.bf16.mxu0 %v1261_v12 }
 0x153   : > { %1164 = vmatpush3.bf16.msra.mxu0 %v1261_v12 }
 0x202   : > { %v691_v13 = vpop.f32.mrf.mxu1 }
 0x204   : > { %v1147_v14 = vpop.f32.mrf.mxu1 }
 0x206   : > { %v645_v15 = vpop.f32.mrf.mxu0  ;;  %v694_v16 = vpop.f32.mrf.mxu1 }
 0x207   : > { %v1089_v17 = vpack.c.bf16 %v691_v13, %v645_v15 }
 0x208   : > { %v1141_v18 = vpop.f32.mrf.mxu0  ;;  %v1148_v0 = vpop.f32.mrf.mxu1 }
 0x209   : > { %1165 = vmatprep.mubr.msk.bf16.mxu0 %vm382_vm1, %v1089_v17 }
 0x20a   : > { %v648_v19 = vpop.f32.mrf.mxu0  ;;  %v783_v20 = vpop.f32.mrf.mxu1 }
 0x20c   : > { %v1142_v21 = vpop.f32.mrf.mxu0  ;;  %v1159_v22 = vpop.f32.mrf.mxu1 }
 0x20e   : > { %v737_v23 = vpop.f32.mrf.mxu0  ;;  %v786_v24 = vpop.f32.mrf.mxu1 }
 0x20f   : > { %v1090_v25 = vpack.c.bf16 %v783_v20, %v737_v23 }
 0x210   : > { %v1153_v26 = vpop.f32.mrf.mxu0  ;;  %v1160_v27 = vpop.f32.mrf.mxu1 }
 0x211   : > { %1166 = vmatmul.mubr.msk.bf16.vlgmr.msra.gmra.mxu0 %vm382_vm1, %v1090_v25 }
 0x212   : > { %v740_v28 = vpop.f32.mrf.mxu0 }
 0x214   : > { %v1154_v29 = vpop.f32.mrf.mxu0 }
 0x2d1   : > { %v1167_v31 = vpop.f32.mrf.mxu0 }
 0x2d2   : > { %v875_v32 = vadd.f32 %v1167_v31, %v1070_v30 }
 0x2d3   : > { %v866_v33 = vpop.f32.mrf.mxu0 }
 0x2d4   : > { %883 = vst.msk [vmem:[%s354_s1 + $0x10] sm:$0xff] %vm382_vm1, %v875_v32  ;;  %v867_v34 = vadd.f32 %v1070_v30, %v866_v33 }
 0x2d5   : > { %v1168_v35 = vpop.f32.mrf.mxu0 }
 0x2d6   : > { %881 = vst.msk [vmem:[%s354_s1] sm:$0xff] %vm382_vm1, %v867_v34  ;;  %v878_v36 = vadd.f32 %v1168_v35, %v1070_v30 }
 0x2d7   : > { %v869_v37 = vpop.f32.mrf.mxu0 }
 0x2d8   : > { %884 = vst.msk [vmem:[%s354_s1 + $0x18] sm:$0xff] %vm382_vm1, %v878_v36  ;;  %v870_v38 = vadd.f32 %v1070_v30, %v869_v37 }
 0x2da   : > { %882 = vst.msk [vmem:[%s354_s1 + $0x8] sm:$0xff] %vm382_vm1, %v870_v38 }
 0x2db   : > { %1385 = shalt.err (!%p1382_p6)
}
 0x2dc   : > { %s1386_s16 = scalar_lea.hbm %s1758_s23, 512  ;;  %s1390_s28 = scalar_lea.hbm %s1813_s5, 1024 }
 0x2dd   : > { %p1387_p9 = scmp.ne.s32.totalorder %s1758_s23, %s1386_s16  ;;  %p1391_p7 = scmp.lt.s32.totalorder %s1758_s23, %s1813_s5 }
 0x2de   : > { %p1392_p2 = scmp.lt.s32.totalorder %s1390_s28, %s1386_s16 }
 0x2df   : > { %p1388_p10 = pnand %p1387_p9, %p1601_p12 }
 0x2e0   : > { %p1393_p11 = por %p1392_p2, %p1391_p7 }
 0x2e1   : > { %p1389_p0 = pneg %p1388_p10 }
 0x2e3   : > { %p1394_p3 = pnand %p1393_p11, %p1389_p0 }
 0x2e5   : > { %1397 = shalt.err (!%p1394_p3)
}
 0x2e6   : > { %s1473_s13 = smov 128   ;;  %s1474_s12 = smov 8  }
 0x2e7   : > { %1179 = dma.vmem_to_hbm [thread:$0]  (%p1601_p12), %s1752_s15, 512, %s1758_s23, %s886_s21, %s1473_s13, %s1473_s13, %s1474_s12  }
 0x2e8 PF: > { %s1847_s7 = sld [smem:[#allocation16_spill]]  ;;  %s916_s9 = sand.u32 1, %s1440_s18  }
 0x2e9   : > { %s917_s1 = scalar_lea.sflag [#allocation4], %s916_s9 }
 0x2ee   : > { %p1848_p1 = scmp.ge.s32.totalorder %s1847_s7, 2 }
 0x2f0   : > { %p1196_p4 = pnand %p1848_p1, %p1605_p13 }
 0x2f2   : > { %p1197_p5 = pneg %p1196_p4 }
 0x2f4   : > { %1435 = dma.done.wait (%p1197_p5), %s917_s1, 512  }
 0x2f5   : > { %1437 = vsyncadd (%p1197_p5), %s917_s1, 4294966784  ;;  %s25_s23 = sadd.s32 1, %s1847_s7   ;;  %s1849_s10 = sld [smem:[#allocation18_spill]] }
 0x2f6   : > { %p22_p8 = scmp.ge.s32.totalorder %s25_s23, 4   ;;  %s1850_s21 = sld [smem:[#allocation15_spill]] }
 0x2f7   : > { %s1851_s22 = sld [smem:[#allocation17_spill]]  ;;  %s1852_s18 = smov %s1444_s19 }
 0x2f8   : > { %s1853_s19 = smov %s1448_s20  ;;  %24 = sbr.rel (!%p22_p8) target bundleno = 12 (0xc), region = 113 }
 0x2fb   : > { %s1854_s20 = smov %s1849_s10 }
 0x2fd   :  { %922 = vsyncpa [#allocation3], 1 }
 0x2fe   :  { %924 = vsyncpa [#allocation3 + $0x1], 1 }
 0x2ff   :  { %925 = vsyncpa [#allocation6], 1 }
 0x300   :  { %927 = vsyncpa [#allocation6 + $0x1], 1 }
 0x301   :  { %928 = vsyncpa [#allocation9], 1 }
 0x302   :  { %929 = vsyncpa [#allocation4], 1 }
 0x303   :  { %931 = vsyncpa [#allocation4 + $0x1], 1 }

</bundles_post_ra>
